<compile_context>
chip_gen: v6e
topology: v6e:2x2x1
jax: 0.10.0
libtpu: 0.0.40
codegen_flags: <defaults>
</compile_context>

<pallas_src>
import math

import jax
import jax.numpy as jnp
from jax.experimental import pallas as pl
from jax.experimental.pallas import tpu as pltpu


def _ffn_kernel(x_ref, w1_ref, b1_ref, w2_ref, b2_ref, o_ref, acc_ref):
    """One (row tile, d_ff chunk) step: acc += relu(x @ W1_k + b1_k) @ W2_k."""
    k = pl.program_id(1)

    @pl.when(k == 0)
    def _init():
        acc_ref[...] = jnp.zeros_like(acc_ref)

    x = x_ref[...]
    h = jnp.dot(x, w1_ref[...], preferred_element_type=jnp.float32)
    h = jnp.maximum(h + b1_ref[...].astype(jnp.float32), jnp.float32(0.0))
    # TODO(synk): training-mode dropout (Bernoulli mask via pltpu.prng_*) is not
    # implemented; this matches the PyTorch module in eval mode (dropout = identity).
    acc_ref[...] += jnp.dot(h.astype(w2_ref.dtype), w2_ref[...],
                            preferred_element_type=jnp.float32)

    @pl.when(k == pl.num_programs(1) - 1)
    def _finalize():
        o_ref[...] = (acc_ref[...] + b2_ref[...].astype(jnp.float32)).astype(o_ref.dtype)


def _round_up(v, m):
    return (v + m - 1) // m * m


def feed_forward_block(x, w1, b1, w2, b2, *, tile_rows=512):
    """Fused FFN forward.

    x:  (..., d_model)
    w1: (d_model, d_ff)   (transpose of torch nn.Linear.weight)
    b1: (d_ff,)
    w2: (d_ff, d_model)
    b2: (d_model,)
    Returns: same shape/dtype as x.
    """
    orig_shape = x.shape
    d_model = orig_shape[-1]
    d_ff = w1.shape[-1]
    rows = math.prod(orig_shape[:-1])

    x2d = x.reshape(rows, d_model)
    b1_2d = b1.reshape(1, d_ff)
    b2_2d = b2.reshape(1, d_model)

    x_isz = jnp.dtype(x.dtype).itemsize
    w_isz = jnp.dtype(w1.dtype).itemsize
    row_mult = {4: 8, 2: 16, 1: 32}.get(x_isz, 8)   # sublane multiple per dtype

    # ---- generation-aware VMEM budget (v5e/v6e: 128 MiB, v7x: 64 MiB per TC) ----
    try:
        vmem_cap = int(pltpu.get_tpu_info().vmem_capacity_bytes)
    except Exception:
        vmem_cap = 64 * 1024 * 1024   # conservative: v7x per-TC VMEM
    limit_cap = min(int(vmem_cap * 0.8), 112 * 1024 * 1024)
    headroom = 2 * 1024 * 1024

    # Activation bytes per row for a given hidden-chunk width:
    #   x tile (2x buffered) + out tile (2x buffered) + f32 accumulator + f32 hidden.
    def act_per_row(tk):
        return 4 * d_model * x_isz + 4 * d_model + 4 * tk

    min_tr = 2 * row_mult                      # smallest useful row tile we budget for
    bias_bytes = (d_ff + d_model) * w_isz
    full_w_bytes = 2 * d_model * d_ff * w_isz + bias_bytes   # single-buffered residency

    # ---- choose the d_ff chunk width ----
    if full_w_bytes + min_tr * act_per_row(d_ff) + headroom <= limit_cap:
        tk_ff = d_ff                            # weights fully VMEM-resident
    else:
        tk_ff = 0
        for cand in (4096, 2048, 1024, 512, 256, 128):
            if cand < d_ff and d_ff % cand == 0:
                chunk_w = 2 * (2 * d_model * cand + cand) * w_isz + d_model * w_isz
                if chunk_w + min_tr * act_per_row(cand) + headroom <= limit_cap:
                    tk_ff = cand
                    break
        if tk_ff == 0:
            # TODO(synk): shapes so large that even 128-wide d_ff chunks do not fit the
            # scoped-VMEM budget (or d_ff is not a multiple of 128); fall back to a
            # single chunk and let the compiler surface the limit rather than mis-tile.
            tk_ff = d_ff

    weights_resident = (tk_ff == d_ff)
    n_kff = 1 if weights_resident else d_ff // tk_ff

    if weights_resident:
        w_resident_bytes = full_w_bytes         # Buffered(1): one copy of each operand
    else:
        w_resident_bytes = 2 * (2 * d_model * tk_ff + tk_ff) * w_isz + d_model * w_isz

    # ---- choose the row tile ----
    act_budget = max(limit_cap - w_resident_bytes - headroom,
                     min_tr * act_per_row(tk_ff))
    max_rows = max(row_mult, (act_budget // act_per_row(tk_ff)) // row_mult * row_mult)
    tr = max(row_mult, (min(tile_rows, max_rows) // row_mult) * row_mult)
    tr = min(tr, _round_up(rows, row_mult))     # never larger than the problem
    if rows > row_mult:
        # keep >=2 row-grid steps so the "parallel" axis can use both v7x TensorCores
        tr = min(tr, _round_up(pl.cdiv(rows, 2), row_mult))

    grid = (pl.cdiv(rows, tr), n_kff)

    # ---- corrected VMEM estimate (no double counting) ----
    needed = w_resident_bytes + tr * act_per_row(tk_ff) + headroom
    vmem_limit = None
    if needed > 16 * 1024 * 1024:
        vmem_limit = int(min(max(needed, 32 * 1024 * 1024), limit_cap))

    cost = pl.CostEstimate(
        flops=4 * rows * d_model * d_ff,
        transcendentals=0,
        bytes_accessed=(2 * rows * d_model * x_isz            # read x + write out once
                        + 2 * d_model * d_ff * w_isz + bias_bytes),   # weights once
    )

    def _build(use_single_buffer):
        if weights_resident:
            if use_single_buffer:
                res = pl.Buffered(1)   # constant index -> no need to double-buffer
                w1_spec = pl.BlockSpec((d_model, d_ff), lambda i, k: (0, 0),
                                       pipeline_mode=res)
                b1_spec = pl.BlockSpec((1, d_ff), lambda i, k: (0, 0),
                                       pipeline_mode=res)
                w2_spec = pl.BlockSpec((d_ff, d_model), lambda i, k: (0, 0),
                                       pipeline_mode=res)
                b2_spec = pl.BlockSpec((1, d_model), lambda i, k: (0, 0),
                                       pipeline_mode=res)
            else:
                w1_spec = pl.BlockSpec((d_model, d_ff), lambda i, k: (0, 0))
                b1_spec = pl.BlockSpec((1, d_ff), lambda i, k: (0, 0))
                w2_spec = pl.BlockSpec((d_ff, d_model), lambda i, k: (0, 0))
                b2_spec = pl.BlockSpec((1, d_model), lambda i, k: (0, 0))
        else:
            # streamed d_ff chunks: keep default double-buffering so DMA overlaps MXU
            w1_spec = pl.BlockSpec((d_model, tk_ff), lambda i, k: (0, k))
            b1_spec = pl.BlockSpec((1, tk_ff), lambda i, k: (0, k))
            w2_spec = pl.BlockSpec((tk_ff, d_model), lambda i, k: (k, 0))
            if use_single_buffer:
                b2_spec = pl.BlockSpec((1, d_model), lambda i, k: (0, 0),
                                       pipeline_mode=pl.Buffered(1))
            else:
                b2_spec = pl.BlockSpec((1, d_model), lambda i, k: (0, 0))

        return pl.pallas_call(
            _ffn_kernel,
            out_shape=jax.ShapeDtypeStruct((rows, d_model), x.dtype),
            grid_spec=pltpu.PrefetchScalarGridSpec(
                num_scalar_prefetch=0,
                grid=grid,
                in_specs=[
                    pl.BlockSpec((tr, d_model), lambda i, k: (i, 0)),   # x row tile
                    w1_spec, b1_spec, w2_spec, b2_spec,
                ],
                out_specs=pl.BlockSpec((tr, d_model), lambda i, k: (i, 0)),
                scratch_shapes=[pltpu.VMEM((tr, d_model), jnp.float32)],
            ),
            compiler_params=pltpu.CompilerParams(
                dimension_semantics=("parallel", "arbitrary"),
                vmem_limit_bytes=vmem_limit,
            ),
            cost_estimate=cost,
        )

    try:
        out2d = _build(True)(x2d, w1, b1_2d, w2, b2_2d)
    except Exception:
        # Graceful fallback if pipeline_mode=pl.Buffered(1) is unavailable in this
        # JAX build: identical math, just default (double-buffered) resident weights.
        out2d = _build(False)(x2d, w1, b1_2d, w2, b2_2d)

    return out2d.reshape(orig_shape)


if __name__ == "__main__":
    # Small shapes implied by the module: (batch, seq_len, d_model) with d_ff expansion.
    # d_model / d_ff chosen as multiples of 128 so loads/stores stay lane-dense.
    batch, seq, d_model, d_ff = 2, 8, 128, 256

    key = jax.random.PRNGKey(0)
    kx, k1, kb1, k2, kb2 = jax.random.split(key, 5)

    x = jax.random.normal(kx, (batch, seq, d_model), dtype=jnp.float32)

    # Parameters in the "x @ W" layout (transpose of torch Linear.weight), initialized
    # like nn.Linear's uniform(-1/sqrt(fan_in), 1/sqrt(fan_in)).
    bound1 = 1.0 / math.sqrt(d_model)
    bound2 = 1.0 / math.sqrt(d_ff)
    w1 = jax.random.uniform(k1, (d_model, d_ff), jnp.float32, -bound1, bound1)
    b1 = jax.random.uniform(kb1, (d_ff,), jnp.float32, -bound1, bound1)
    w2 = jax.random.uniform(k2, (d_ff, d_model), jnp.float32, -bound2, bound2)
    b2 = jax.random.uniform(kb2, (d_model,), jnp.float32, -bound2, bound2)

    out = feed_forward_block(x, w1, b1, w2, b2)
    out = jax.block_until_ready(out)

    # Pure-JAX reference (dropout is identity in eval mode).
    ref = jnp.maximum(x @ w1 + b1, 0.0) @ w2 + b2

    assert out.shape == x.shape, "shape mismatch"
    assert jnp.allclose(out, ref, atol=2e-3, rtol=2e-3), "mismatch vs reference"

    print("KERNEL_OK")
</pallas_src>

<mosaic_0001>
module attributes {stable_mosaic.version = 11 : i64} {
  func.func @_ffn_kernel(%arg0: i32, %arg1: i32, %arg2: memref<8x128xf32, #tpu.memory_space<vmem>>, %arg3: memref<128x256xf32, #tpu.memory_space<vmem>>, %arg4: memref<1x256xf32, #tpu.memory_space<vmem>>, %arg5: memref<256x128xf32, #tpu.memory_space<vmem>>, %arg6: memref<1x128xf32, #tpu.memory_space<vmem>>, %arg7: memref<8x128xf32, #tpu.memory_space<vmem>>, %arg8: memref<8x128xf32, #tpu.memory_space<vmem>>) attributes {dimension_semantics = [#tpu.dimension_semantics<parallel>, #tpu.dimension_semantics<arbitrary>], iteration_bounds = array<i64: 2, 1>, scalar_prefetch = 0 : i64, scratch_operands = 1 : i64, tpu.core_type = #tpu.core_type<tc>, window_params = [{transform_indices = @transform_0, window_bounds = array<i64: 8, 128>}, {pipeline_mode = #tpu.pipeline_mode<synchronous>, transform_indices = @transform_1, window_bounds = array<i64: 128, 256>}, {pipeline_mode = #tpu.pipeline_mode<synchronous>, transform_indices = @transform_2, window_bounds = array<i64: 1, 256>}, {pipeline_mode = #tpu.pipeline_mode<synchronous>, transform_indices = @transform_3, window_bounds = array<i64: 256, 128>}, {pipeline_mode = #tpu.pipeline_mode<synchronous>, transform_indices = @transform_4, window_bounds = array<i64: 1, 128>}, {transform_indices = @transform_5, window_bounds = array<i64: 8, 128>}]} {
    %c0_i32 = arith.constant 0 : i32
    %0 = arith.cmpi eq, %arg1, %c0_i32 : i32
    %1 = arith.extui %0 : i1 to i32
    %c0_i32_0 = arith.constant 0 : i32
    %2 = arith.cmpi ne, %1, %c0_i32_0 : i32
    scf.if %2 {
      %cst_16 = arith.constant 0.000000e+00 : f32
      %19 = vector.broadcast %cst_16 : f32 to vector<8x128xf32>
      %c0_17 = arith.constant 0 : index
      %c0_18 = arith.constant 0 : index
      %20 = vector.load %arg8[%c0_17, %c0_18] : memref<8x128xf32, #tpu.memory_space<vmem>>, vector<8x128xf32>
      tpu.vector_store %arg8[%c0_17, %c0_18], %19 {strides = array<i32>} : memref<8x128xf32, #tpu.memory_space<vmem>>, vector<8x128xf32>,
    } else {
    }
    %c0 = arith.constant 0 : index
    %c0_1 = arith.constant 0 : index
    %3 = vector.load %arg2[%c0, %c0_1] : memref<8x128xf32, #tpu.memory_space<vmem>>, vector<8x128xf32>
    %c0_2 = arith.constant 0 : index
    %c0_3 = arith.constant 0 : index
    %4 = vector.load %arg3[%c0_2, %c0_3] : memref<128x256xf32, #tpu.memory_space<vmem>>, vector<128x256xf32>
    %cst = arith.constant dense<0.000000e+00> : vector<8x256xf32>
    %5 = tpu.matmul %3, %4, %cst {dimension_numbers = #tpu.dot_dimension_numbers<[1], [0], [0], [1], [0, 0, 1, 1], [], []>} : vector<8x128xf32>, vector<128x256xf32>, vector<8x256xf32> -> vector<8x256xf32>
    %c0_4 = arith.constant 0 : index
    %c0_5 = arith.constant 0 : index
    %6 = vector.load %arg4[%c0_4, %c0_5] : memref<1x256xf32, #tpu.memory_space<vmem>>, vector<1x256xf32>
    %7 = vector.broadcast %6 : vector<1x256xf32> to vector<8x256xf32>
    %8 = arith.addf %5, %7 : vector<8x256xf32>
    %cst_6 = arith.constant 0.000000e+00 : f32
    %9 = vector.broadcast %cst_6 : f32 to vector<8x256xf32>
    %10 = arith.maximumf %8, %9 : vector<8x256xf32>
    %c0_7 = arith.constant 0 : index
    %c0_8 = arith.constant 0 : index
    %11 = vector.load %arg8[%c0_7, %c0_8] : memref<8x128xf32, #tpu.memory_space<vmem>>, vector<8x128xf32>
    %c0_9 = arith.constant 0 : index
    %c0_10 = arith.constant 0 : index
    %12 = vector.load %arg5[%c0_9, %c0_10] : memref<256x128xf32, #tpu.memory_space<vmem>>, vector<256x128xf32>
    %cst_11 = arith.constant dense<0.000000e+00> : vector<8x128xf32>
    %13 = tpu.matmul %10, %12, %cst_11 {dimension_numbers = #tpu.dot_dimension_numbers<[1], [0], [0], [1], [0, 0, 1, 1], [], []>} : vector<8x256xf32>, vector<256x128xf32>, vector<8x128xf32> -> vector<8x128xf32>
    %14 = arith.addf %11, %13 : vector<8x128xf32>
    %c0_12 = arith.constant 0 : index
    %c0_13 = arith.constant 0 : index
    %15 = vector.load %arg8[%c0_12, %c0_13] : memref<8x128xf32, #tpu.memory_space<vmem>>, vector<8x128xf32>
    tpu.vector_store %arg8[%c0_12, %c0_13], %14 {strides = array<i32>} : memref<8x128xf32, #tpu.memory_space<vmem>>, vector<8x128xf32>,
    %c0_i32_14 = arith.constant 0 : i32
    %16 = arith.cmpi eq, %arg1, %c0_i32_14 : i32
    %17 = arith.extui %16 : i1 to i32
    %c0_i32_15 = arith.constant 0 : i32
    %18 = arith.cmpi ne, %17, %c0_i32_15 : i32
    scf.if %18 {
      %c0_16 = arith.constant 0 : index
      %c0_17 = arith.constant 0 : index
      %19 = vector.load %arg8[%c0_16, %c0_17] : memref<8x128xf32, #tpu.memory_space<vmem>>, vector<8x128xf32>
      %c0_18 = arith.constant 0 : index
      %c0_19 = arith.constant 0 : index
      %20 = vector.load %arg6[%c0_18, %c0_19] : memref<1x128xf32, #tpu.memory_space<vmem>>, vector<1x128xf32>
      %21 = vector.broadcast %20 : vector<1x128xf32> to vector<8x128xf32>
      %22 = arith.addf %19, %21 : vector<8x128xf32>
      %c0_20 = arith.constant 0 : index
      %c0_21 = arith.constant 0 : index
      %23 = vector.load %arg7[%c0_20, %c0_21] : memref<8x128xf32, #tpu.memory_space<vmem>>, vector<8x128xf32>
      tpu.vector_store %arg7[%c0_20, %c0_21], %22 {strides = array<i32>} : memref<8x128xf32, #tpu.memory_space<vmem>>, vector<8x128xf32>,
    } else {
    }
    return
  }
  func.func @transform_0(%arg0: i32, %arg1: i32) -> (i32, i32) {
    %c0_i32 = arith.constant 0 : i32
    %c0_i32_0 = arith.constant 0 : i32
    return %arg0, %c0_i32 : i32, i32
  }
  func.func @transform_1(%arg0: i32, %arg1: i32) -> (i32, i32) {
    %c0_i32 = arith.constant 0 : i32
    %c0_i32_0 = arith.constant 0 : i32
    %c0_i32_1 = arith.constant 0 : i32
    return %c0_i32, %c0_i32_0 : i32, i32
  }
  func.func @transform_2(%arg0: i32, %arg1: i32) -> (i32, i32) {
    %c0_i32 = arith.constant 0 : i32
    %c0_i32_0 = arith.constant 0 : i32
    %c0_i32_1 = arith.constant 0 : i32
    return %c0_i32, %c0_i32_0 : i32, i32
  }
  func.func @transform_3(%arg0: i32, %arg1: i32) -> (i32, i32) {
    %c0_i32 = arith.constant 0 : i32
    %c0_i32_0 = arith.constant 0 : i32
    %c0_i32_1 = arith.constant 0 : i32
    return %c0_i32, %c0_i32_0 : i32, i32
  }
  func.func @transform_4(%arg0: i32, %arg1: i32) -> (i32, i32) {
    %c0_i32 = arith.constant 0 : i32
    %c0_i32_0 = arith.constant 0 : i32
    %c0_i32_1 = arith.constant 0 : i32
    return %c0_i32, %c0_i32_0 : i32, i32
  }
  func.func @transform_5(%arg0: i32, %arg1: i32) -> (i32, i32) {
    %c0_i32 = arith.constant 0 : i32
    %c0_i32_0 = arith.constant 0 : i32
    return %arg0, %c0_i32 : i32, i32
  }
}

module attributes {stable_mosaic.version = 11 : i64} {
  func.func @_ffn_kernel(%arg0: i32, %arg1: i32, %arg2: memref<8x128xf32, #tpu.memory_space<vmem>>, %arg3: memref<128x256xf32, #tpu.memory_space<vmem>>, %arg4: memref<1x256xf32, #tpu.memory_space<vmem>>, %arg5: memref<256x128xf32, #tpu.memory_space<vmem>>, %arg6: memref<1x128xf32, #tpu.memory_space<vmem>>, %arg7: memref<8x128xf32, #tpu.memory_space<vmem>>, %arg8: memref<8x128xf32, #tpu.memory_space<vmem>>) attributes {dimension_semantics = [#tpu.dimension_semantics<parallel>, #tpu.dimension_semantics<arbitrary>], iteration_bounds = array<i64: 2, 1>, scalar_prefetch = 0 : i64, scratch_operands = 1 : i64, tpu.core_type = #tpu.core_type<tc>, window_params = [{transform_indices = @transform_0, window_bounds = array<i64: 8, 128>}, {pipeline_mode = #tpu.pipeline_mode<synchronous>, transform_indices = @transform_1, window_bounds = array<i64: 128, 256>}, {pipeline_mode = #tpu.pipeline_mode<synchronous>, transform_indices = @transform_2, window_bounds = array<i64: 1, 256>}, {pipeline_mode = #tpu.pipeline_mode<synchronous>, transform_indices = @transform_3, window_bounds = array<i64: 256, 128>}, {pipeline_mode = #tpu.pipeline_mode<synchronous>, transform_indices = @transform_4, window_bounds = array<i64: 1, 128>}, {transform_indices = @transform_5, window_bounds = array<i64: 8, 128>}]} {
    %c0_i32 = arith.constant 0 : i32
    %0 = arith.cmpi eq, %arg1, %c0_i32 : i32
    %1 = arith.extui %0 : i1 to i32
    %c0_i32_0 = arith.constant 0 : i32
    %2 = arith.cmpi ne, %1, %c0_i32_0 : i32
    scf.if %2 {
      %cst_16 = arith.constant 0.000000e+00 : f32
      %19 = vector.broadcast %cst_16 : f32 to vector<8x128xf32>
      %c0_17 = arith.constant 0 : index
      %c0_18 = arith.constant 0 : index
      %20 = vector.load %arg8[%c0_17, %c0_18] : memref<8x128xf32, #tpu.memory_space<vmem>>, vector<8x128xf32>
      tpu.vector_store %arg8[%c0_17, %c0_18], %19 {strides = array<i32>} : memref<8x128xf32, #tpu.memory_space<vmem>>, vector<8x128xf32>,
    } else {
    }
    %c0 = arith.constant 0 : index
    %c0_1 = arith.constant 0 : index
    %3 = vector.load %arg2[%c0, %c0_1] : memref<8x128xf32, #tpu.memory_space<vmem>>, vector<8x128xf32>
    %c0_2 = arith.constant 0 : index
    %c0_3 = arith.constant 0 : index
    %4 = vector.load %arg3[%c0_2, %c0_3] : memref<128x256xf32, #tpu.memory_space<vmem>>, vector<128x256xf32>
    %cst = arith.constant dense<0.000000e+00> : vector<8x256xf32>
    %5 = tpu.matmul %3, %4, %cst {dimension_numbers = #tpu.dot_dimension_numbers<[1], [0], [0], [1], [0, 0, 1, 1], [], []>} : vector<8x128xf32>, vector<128x256xf32>, vector<8x256xf32> -> vector<8x256xf32>
    %c0_4 = arith.constant 0 : index
    %c0_5 = arith.constant 0 : index
    %6 = vector.load %arg4[%c0_4, %c0_5] : memref<1x256xf32, #tpu.memory_space<vmem>>, vector<1x256xf32>
    %7 = vector.broadcast %6 : vector<1x256xf32> to vector<8x256xf32>
    %8 = arith.addf %5, %7 : vector<8x256xf32>
    %cst_6 = arith.constant 0.000000e+00 : f32
    %9 = vector.broadcast %cst_6 : f32 to vector<8x256xf32>
    %10 = arith.maximumf %8, %9 : vector<8x256xf32>
    %c0_7 = arith.constant 0 : index
    %c0_8 = arith.constant 0 : index
    %11 = vector.load %arg8[%c0_7, %c0_8] : memref<8x128xf32, #tpu.memory_space<vmem>>, vector<8x128xf32>
    %c0_9 = arith.constant 0 : index
    %c0_10 = arith.constant 0 : index
    %12 = vector.load %arg5[%c0_9, %c0_10] : memref<256x128xf32, #tpu.memory_space<vmem>>, vector<256x128xf32>
    %cst_11 = arith.constant dense<0.000000e+00> : vector<8x128xf32>
    %13 = tpu.matmul %10, %12, %cst_11 {dimension_numbers = #tpu.dot_dimension_numbers<[1], [0], [0], [1], [0, 0, 1, 1], [], []>} : vector<8x256xf32>, vector<256x128xf32>, vector<8x128xf32> -> vector<8x128xf32>
    %14 = arith.addf %11, %13 : vector<8x128xf32>
    %c0_12 = arith.constant 0 : index
    %c0_13 = arith.constant 0 : index
    %15 = vector.load %arg8[%c0_12, %c0_13] : memref<8x128xf32, #tpu.memory_space<vmem>>, vector<8x128xf32>
    tpu.vector_store %arg8[%c0_12, %c0_13], %14 {strides = array<i32>} : memref<8x128xf32, #tpu.memory_space<vmem>>, vector<8x128xf32>,
    %c0_i32_14 = arith.constant 0 : i32
    %16 = arith.cmpi eq, %arg1, %c0_i32_14 : i32
    %17 = arith.extui %16 : i1 to i32
    %c0_i32_15 = arith.constant 0 : i32
    %18 = arith.cmpi ne, %17, %c0_i32_15 : i32
    scf.if %18 {
      %c0_16 = arith.constant 0 : index
      %c0_17 = arith.constant 0 : index
      %19 = vector.load %arg8[%c0_16, %c0_17] : memref<8x128xf32, #tpu.memory_space<vmem>>, vector<8x128xf32>
      %c0_18 = arith.constant 0 : index
      %c0_19 = arith.constant 0 : index
      %20 = vector.load %arg6[%c0_18, %c0_19] : memref<1x128xf32, #tpu.memory_space<vmem>>, vector<1x128xf32>
      %21 = vector.broadcast %20 : vector<1x128xf32> to vector<8x128xf32>
      %22 = arith.addf %19, %21 : vector<8x128xf32>
      %c0_20 = arith.constant 0 : index
      %c0_21 = arith.constant 0 : index
      %23 = vector.load %arg7[%c0_20, %c0_21] : memref<8x128xf32, #tpu.memory_space<vmem>>, vector<8x128xf32>
      tpu.vector_store %arg7[%c0_20, %c0_21], %22 {strides = array<i32>} : memref<8x128xf32, #tpu.memory_space<vmem>>, vector<8x128xf32>,
    } else {
    }
    return
  }
  func.func @transform_0(%arg0: i32, %arg1: i32) -> (i32, i32) {
    %c0_i32 = arith.constant 0 : i32
    %c0_i32_0 = arith.constant 0 : i32
    return %arg0, %c0_i32 : i32, i32
  }
  func.func @transform_1(%arg0: i32, %arg1: i32) -> (i32, i32) {
    %c0_i32 = arith.constant 0 : i32
    %c0_i32_0 = arith.constant 0 : i32
    %c0_i32_1 = arith.constant 0 : i32
    return %c0_i32, %c0_i32_0 : i32, i32
  }
  func.func @transform_2(%arg0: i32, %arg1: i32) -> (i32, i32) {
    %c0_i32 = arith.constant 0 : i32
    %c0_i32_0 = arith.constant 0 : i32
    %c0_i32_1 = arith.constant 0 : i32
    return %c0_i32, %c0_i32_0 : i32, i32
  }
  func.func @transform_3(%arg0: i32, %arg1: i32) -> (i32, i32) {
    %c0_i32 = arith.constant 0 : i32
    %c0_i32_0 = arith.constant 0 : i32
    %c0_i32_1 = arith.constant 0 : i32
    return %c0_i32, %c0_i32_0 : i32, i32
  }
  func.func @transform_4(%arg0: i32, %arg1: i32) -> (i32, i32) {
    %c0_i32 = arith.constant 0 : i32
    %c0_i32_0 = arith.constant 0 : i32
    %c0_i32_1 = arith.constant 0 : i32
    return %c0_i32, %c0_i32_0 : i32, i32
  }
  func.func @transform_5(%arg0: i32, %arg1: i32) -> (i32, i32) {
    %c0_i32 = arith.constant 0 : i32
    %c0_i32_0 = arith.constant 0 : i32
    return %arg0, %c0_i32 : i32, i32
  }
}

</mosaic_0001>

<bundles_post_ra>
// kernel: tpu_custom_call.1
= control target key start
LH: loop header
LB: loop body
LE: loop exit
PB: predicated region body
PF: predicated region fallthrough
CT: control target
= control target key end

     0   :  { %s1166_s0 = inlined_call_operand.hbm [shape: f32[16,128], index: 0, kind: input, shape index: {}]   ;;  %s1167_s1 = inlined_call_operand.hbm [shape: f32[128,256], index: 1, kind: input, shape index: {}]   ;;  %s1168_s2 = inlined_call_operand.vmem [shape: f32[1,256], index: 2, kind: input, shape index: {}]   ;;  %s1169_s3 = inlined_call_operand.hbm [shape: f32[256,128], index: 3, kind: input, shape index: {}]   ;;  %s1170_s4 = inlined_call_operand.vmem [shape: f32[1,128], index: 4, kind: input, shape index: {}]   ;;  %s1171_s5 = inlined_call_operand.hbm [shape: f32[16,128], index: 5, kind: output, shape index: {}]  }
   0x1   :  { %1175 = sst [smem:[#allocation13_spill]] %s1167_s1 }
   0x2   :  { %10 = vsyncpa [#allocation4], 0 }
   0x3   :  { %12 = vsyncpa [#allocation4 + $0x1], 0 }
   0x4   :  { %13 = vsyncpa [#allocation7], 0 }
   0x5   :  { %14 = vsyncpa [#allocation5], 0 }
   0x6   :  { %16 = vsyncpa [#allocation5 + $0x1], 0  ;;  %s979_s18 = smov 0   ;;  %s981_s19 = smov 0  }
   0x7   :  { %s983_s20 = smov 0   ;;  %s985_s21 = smov 0  }
   0x8   :  { %s987_s22 = smov 0   ;;  %s989_s23 = smov 0  }
   0x9 LB: > { %s633_s24 = sadd.s32 4294967295, %s938_s23   ;;  %s634_s25 = sadd.s32 4294967294, %s938_s23   ;;  %s938_s23 = sphi %s989_s23, %s22_s23   ;;  %s934_s22 = sphi %s987_s22, %s1193_s22   ;;  %s930_s21 = sphi %s985_s21, %s1192_s21   ;;  %s926_s20 = sphi %s983_s20, %s1191_s20   ;;  %s922_s19 = sphi %s981_s19, %s1190_s19   ;;  %s918_s18 = sphi %s979_s18, %s1189_s18  }
   0xa   : > { %p54_p0 = scmp.ne.s32.totalorder %s922_s19, %s918_s18  ;;  %p1013_p1 = scmp.eq.s32.totalorder %s633_s24, 0 }
   0xb   : > { %p1017_p2 = scmp.eq.s32.totalorder %s633_s24, 1  ;;  %p168_p3 = scmp.eq.s32.totalorder %s634_s25, 1 }
   0xc   : > { %s1176_s26 = scalar_select %p1013_p1, 1, 0 }
   0xd   : > { %p1023_p4 = por %p1013_p1, %p54_p0  ;;  %p635_p5 = scmp.ge.s32.totalorder %s938_s23, 1 }
   0xe   : > { %p1028_p6 = por %p168_p3, %p54_p0  ;;  %p175_p7 = scmp.lt.s32.totalorder %s938_s23, 3 }
   0xf   : > { %s1178_s28 = scalar_select %p1023_p4, 1, 0 }
  0x10   : > { %s1179_s29 = scalar_select %p1028_p6, 1, 0 }
  0x11   : > { %p1033_p8 = pnand %p635_p5, %p175_p7  ;;  %s940_s6 = smov [#allocation6]  }
  0x12   : > { %s187_s7 = sshll.u32 %s940_s6, 4  ;;  %s941_s9 = smov [#allocation8]   ;;  %s188_s7 = int_to_ptr.vmem [resolvable:$true] %s187_s7 }
  0x13   : > { %p698_p9 = pneg %p1033_p8  ;;  %s203_s10 = sshll.u32 %s941_s9, 4  ;;  %s204_s10 = int_to_ptr.vmem [resolvable:$true] %s203_s10 }
  0x14   : > { %s785_s11 = scalar_lea.vmem %s188_s7, 4096  ;;  %p793_p5 = scmp.lt.s32.totalorder %s188_s7, %s188_s7 }
  0x15   : > { %p1042_p11 = pnand %p698_p9, %p1013_p1  ;;  %p786_p13 = scmp.ne.s32.totalorder %s188_s7, %s785_s11 }
  0x16   : > { %p794_p7 = scmp.lt.s32.totalorder %s785_s11, %s785_s11 }
  0x17   : > { %p776_p12 = pneg %p1042_p11 }
  0x18   : > { %p795_p10 = por %p794_p7, %p793_p5 }
  0x19   : > { %p788_p0 = pnand %p786_p13, %p776_p12 }
  0x1b   : > { %p789_p3 = pneg %p788_p0 }
  0x1d   : > { %p796_p9 = pnand %p795_p10, %p789_p3 }
  0x1f   : > { %799 = shalt.err (!%p796_p9)
}
  0x20   : > { %s942_s12 = smov 256   ;;  %s943_s13 = smov 16  }
  0x21   : > { %s1182_s1 = sld [smem:[#allocation13_spill]]  ;;  %s811_s16 = scalar_lea.vmem %s204_s10, 4096 }
  0x22   : > { %p812_p6 = scmp.ne.s32.totalorder %s204_s10, %s811_s16  ;;  %p819_p1 = scmp.lt.s32.totalorder %s204_s10, %s204_s10 }
  0x23   : > { %p820_p4 = scmp.lt.s32.totalorder %s811_s16, %s811_s16 }
  0x24   : > { %p814_p13 = pnand %p812_p6, %p776_p12 }
  0x25   : > { %p821_p5 = por %p820_p4, %p819_p1 }
  0x26   : > { %p815_p0 = pneg %p814_p13 }
  0x27   : > { %701 = dma.hbm_to_vmem [thread:$0]  (!%p1042_p11), %s1182_s1, 4096, %s188_s7, [#allocation7], %s942_s12, %s942_s12, %s943_s13  }
  0x28   : > { %p822_p10 = pnand %p821_p5, %p815_p0 }
  0x2a   : > { %825 = shalt.err (!%p822_p10)
}
  0x2b   : > { %s944_s17 = smov 128   ;;  %s945_s24 = smov 8  }
  0x2c   : > { %704 = dma.hbm_to_vmem [thread:$0]  (!%p1042_p11), %s1169_s3, 4096, %s204_s10, [#allocation7], %s944_s17, %s944_s17, %s945_s24  }
  0x2d   : > { %s34_s7 = sadd.s32 1, %s934_s22  ;;  %s41_s9 = sadd.s32 1, %s926_s20 }
  0x2e   : > { %p36_p1 = scmp.ge.s32.totalorder %s34_s7, 2  ;;  %p48_p4 = scmp.ne.s32.totalorder %s926_s20, %s922_s19 }
  0x2f   : > { %p49_p6 = scmp.eq.s32.totalorder %s938_s23, 0  ;;  %p715_p12 = scmp.lt.s32.totalorder %s938_s23, 2 }
  0x30   : > { %s1195_s7 = smov (%p36_p1, %s34_s7), 0  ;;  %p1074_p7 = por %p1017_p2, %p48_p4 }
  0x31   : > { %p50_p3 = por %p49_p6, %p48_p4  ;;  %s38_s8 = ssub.s32 %s934_s22, %s1195_s7 }
  0x32   : > { %s220_s12 = sand.u32 1, %s926_s20   ;;  %p39_p9 = scmp.eq.s32.totalorder %s38_s8, 0 }
  0x33   : > { %s639_s10 = sshll.u32 %s220_s12, 3  ;;  %s640_s13 = sshll.u32 %s934_s22, 7 }
  0x34   : > { %s1083_s14 = scalar_select %p39_p9, %s926_s20, %s41_s9  }
  0x35   : > { %s229_s17 = scalar_lea.hbm %s1166_s0, %s640_s13  ;;  %s224_s24 = scalar_lea.vmem [#allocation3], %s639_s10 }
  0x36   : > { %s231_s25 = sshll.u32 %s224_s24, 4  ;;  %p1090_p11 = pnand %p715_p12, %p50_p3  ;;  %s232_s25 = int_to_ptr.vmem [resolvable:$true] %s231_s25 }
  0x37   : > { %s221_s6 = scalar_lea.sflag [#allocation4], %s220_s12  ;;  %s839_s8 = scalar_lea.vmem %s232_s25, 128 }
  0x38   : > { %p828_p2 = pneg %p1090_p11  ;;  %p840_p13 = scmp.ne.s32.totalorder %s232_s25, %s839_s8 }
  0x39   : > { %s946_s9 = smov [#allocation3]  }
  0x3a   : > { %p842_p0 = pnand %p840_p13, %p828_p2  ;;  %s844_s1 = sshll.u32 %s946_s9, 4  ;;  %s845_s1 = int_to_ptr.vmem [resolvable:$false] %s844_s1 }
  0x3b   : > { %s846_s13 = scalar_lea.vmem %s845_s1, 256  ;;  %p847_p10 = scmp.lt.s32.totalorder %s232_s25, %s845_s1 }
  0x3c   : > { %p843_p5 = pneg %p842_p0  ;;  %p848_p1 = scmp.lt.s32.totalorder %s846_s13, %s839_s8 }
  0x3e   : > { %p849_p4 = por %p848_p1, %p847_p10 }
  0x40   : > { %p850_p6 = pnand %p849_p4, %p843_p5 }
  0x42   : > { %853 = shalt.err (!%p850_p6)
}
  0x43   : > { %708 = dma.hbm_to_vmem [thread:$0]  (!%p1090_p11), %s229_s17, 128, %s232_s25, %s221_s6  }
  0x44   : > { %240 = sbr.rel (%p1033_p8) target bundleno = 522 (0x20a), region = 40  ;;  %s1101_s12 = sand.u32 (!%p1033_p8), 1, %s922_s19  }
  0x45   : > { %s642_s10 = sshll.u32 (!%p1033_p8), %s1101_s12, 3  ;;  %s243_s15 = scalar_lea.sflag (!%p1033_p8), [#allocation4], %s1101_s12 }
  0x46   : > { %s1107_s1 = scalar_lea.vmem (!%p1033_p8), [#allocation3], %s642_s10  ;;  %p1185_p12 = scmp.ne.s32.totalorder (!%p1033_p8), %s1178_s28, 0 }
  0x49   : > { %905 = dma.done.wait (%p1185_p12), %s243_s15, 128  }
  0x4a   : > { %907 = vsyncadd (%p1185_p12), %s243_s15, 4294967168  ;;  %p1186_p3 = scmp.ne.s32.totalorder %s1176_s26, 0 }
  0x4c   : > { %909 = dma.done.wait (%p1186_p3), [#allocation7], 8192  }
  0x4d   : > { %911 = vsyncadd (%p1186_p3), [#allocation7], 4294959104  ;;  %v947_v0 = vmov 0.0   ;;  %v318_v1 = vld [vmem:[#allocation6 + $0xf8] sm:$0xff]  ;;  %v317_v2 = vld [vmem:[#allocation6 + $0xf0] sm:$0xff]  ;;  %s648_s17 = sshll.u32 %s930_s21, 7 }
  0x4e   : > { %395 = vmatprep.mubr.f32.mxu0 %v947_v0  ;;  %v316_v3 = vld [vmem:[#allocation6 + $0xe8] sm:$0xff]  ;;  %331 = vmatprep.subr.mxu0 %v318_v1  ;;  %v315_v4 = vld [vmem:[#allocation6 + $0xe0] sm:$0xff]  ;;  %v314_v5 = vld [vmem:[#allocation6 + $0xd8] sm:$0xff]  ;;  %s280_s24 = scalar_lea.vmem [#allocation9], %s642_s10  ;;  %s534_s8 = scalar_lea.hbm %s1171_s5, %s648_s17 }
  0x4f   : > { %332 = vmatpush1.msra.mxu0 %v317_v2  ;;  %v313_v6 = vld [vmem:[#allocation6 + $0xd0] sm:$0xff]  ;;  %v312_v7 = vld [vmem:[#allocation6 + $0xc8] sm:$0xff]  ;;  %v311_v8 = vld [vmem:[#allocation6 + $0xc0] sm:$0xff]  ;;  %v321_v2 = vlaneseq  ;;  %s536_s25 = sshll.u32 %s280_s24, 4  ;;  %s523_s9 = scalar_lea.sflag [#allocation5], %s1101_s12  ;;  %s537_s25 = int_to_ptr.vmem [resolvable:$true] %s536_s25 }
  0x50   : > { %333 = vmatprep.subr.mxu0 %v316_v3  ;;  %v310_v9 = vld [vmem:[#allocation6 + $0xb8] sm:$0xff]  ;;  %v309_v10 = vld [vmem:[#allocation6 + $0xb0] sm:$0xff]  ;;  %v308_v11 = vld [vmem:[#allocation6 + $0xa8] sm:$0xff]  ;;  %s854_s13 = scalar_lea.vmem %s537_s25, 128  ;;  %s948_s15 = smov [#allocation9]  }
  0x51   : > { %334 = vmatpush1.msra.mxu0 %v315_v4  ;;  %v307_v12 = vld [vmem:[#allocation6 + $0xa0] sm:$0xff]  ;;  %v306_v13 = vld [vmem:[#allocation6 + $0x98] sm:$0xff]  ;;  %v305_v14 = vld [vmem:[#allocation6 + $0x90] sm:$0xff]  ;;  %v322_v3 = vshrl.u32 %v321_v2, 7  ;;  %p855_p8 = scmp.ne.s32.totalorder %s537_s25, %s854_s13 }
  0x52   : > { %335 = vmatprep.subr.mxu0 %v314_v5  ;;  %v436_v15 = vld [vmem:[#allocation8 + $0xf8] sm:$0xff]  ;;  %v435_v17 = vld [vmem:[#allocation8 + $0xf0] sm:$0xff]  ;;  %v304_v18 = vld [vmem:[#allocation6 + $0x88] sm:$0xff] }
  0x53   : > { %336 = vmatpush1.msra.mxu0 %v313_v6  ;;  %v420_v16 = vld [vmem:[#allocation8 + $0x78] sm:$0xff]  ;;  %651 = vmatprep.subr.mxu1 %v436_v15  ;;  %v419_v19 = vld [vmem:[#allocation8 + $0x70] sm:$0xff]  ;;  %v303_v20 = vld [vmem:[#allocation6 + $0x80] sm:$0xff]  ;;  %v323_v4 = vsub.s32 0, %v322_v3  ;;  %v327_v6 = vsub.s32 1, %v322_v3  ;;  %p856_p9 = pnand %p855_p8, %p1074_p7 }
  0x54   : > { %337 = vmatprep.subr.mxu0 %v312_v7  ;;  %652 = vmatpush3.msra.mxu1 %v420_v16  ;;  %v434_v21 = vld [vmem:[#allocation8 + $0xe8] sm:$0xff]  ;;  %v302_v22 = vld [vmem:[#allocation6 + $0x78] sm:$0xff]  ;;  %v301_v24 = vld [vmem:[#allocation6 + $0x70] sm:$0xff] }
  0x55   : > { %338 = vmatpush1.msra.mxu0 %v311_v8  ;;  %653 = vmatprep.subr.mxu1 %v435_v17  ;;  %v418_v23 = vld [vmem:[#allocation8 + $0x68] sm:$0xff]  ;;  %v433_v25 = vld [vmem:[#allocation8 + $0xe0] sm:$0xff]  ;;  %v432_v29 = vld [vmem:[#allocation8 + $0xd8] sm:$0xff]  ;;  %p857_p11 = pneg %p856_p9 }
  0x56   : > { %339 = vmatprep.subr.mxu0 %v310_v9  ;;  %654 = vmatpush3.msra.mxu1 %v419_v19  ;;  %v300_v26 = vld [vmem:[#allocation6 + $0x68] sm:$0xff]  ;;  %v417_v27 = vld [vmem:[#allocation8 + $0x60] sm:$0xff]  ;;  %v298_v30 = vld [vmem:[#allocation6 + $0x58] sm:$0xff] }
  0x57   : > { %340 = vmatpush1.msra.mxu0 %v309_v10  ;;  %655 = vmatprep.subr.mxu1 %v434_v21  ;;  %v299_v28 = vld [vmem:[#allocation6 + $0x60] sm:$0xff]  ;;  %v416_v31 = vld [vmem:[#allocation8 + $0x58] sm:$0xff]  ;;  %v297_v32 = vld [vmem:[#allocation6 + $0x50] sm:$0xff] }
  0x58   : > { %341 = vmatprep.subr.mxu0 %v308_v11  ;;  %656 = vmatpush3.msra.mxu1 %v418_v23  ;;  %v431_v33 = vld [vmem:[#allocation8 + $0xd0] sm:$0xff]  ;;  %v296_v34 = vld [vmem:[#allocation6 + $0x48] sm:$0xff]  ;;  %v295_v36 = vld [vmem:[#allocation6 + $0x40] sm:$0xff] }
  0x59   : > { %342 = vmatpush1.msra.mxu0 %v307_v12  ;;  %657 = vmatprep.subr.mxu1 %v433_v25  ;;  %v415_v35 = vld [vmem:[#allocation8 + $0x50] sm:$0xff]  ;;  %v430_v37 = vld [vmem:[#allocation8 + $0xc8] sm:$0xff]  ;;  %v294_v38 = vld [vmem:[#allocation6 + $0x38] sm:$0xff] }
  0x5a   : > { %343 = vmatprep.subr.mxu0 %v306_v13  ;;  %658 = vmatpush3.msra.mxu1 %v417_v27  ;;  %v414_v39 = vld [vmem:[#allocation8 + $0x48] sm:$0xff]  ;;  %v293_v40 = vld [vmem:[#allocation6 + $0x30] sm:$0xff]  ;;  %v429_v41 = vld [vmem:[#allocation8 + $0xc0] sm:$0xff] }
  0x5b   : > { %344 = vmatpush1.msra.mxu0 %v305_v14  ;;  %659 = vmatprep.subr.mxu1 %v432_v29  ;;  %v292_v42 = vld [vmem:[#allocation6 + $0x28] sm:$0xff]  ;;  %v413_v43 = vld [vmem:[#allocation8 + $0x40] sm:$0xff]  ;;  %v428_v45 = vld [vmem:[#allocation8 + $0xb8] sm:$0xff] }
  0x5c   : > { %345 = vmatprep.subr.mxu0 %v304_v18  ;;  %660 = vmatpush3.msra.mxu1 %v416_v31  ;;  %v291_v44 = vld [vmem:[#allocation6 + $0x20] sm:$0xff]  ;;  %v290_v46 = vld [vmem:[#allocation6 + $0x18] sm:$0xff]  ;;  %v289_v48 = vld [vmem:[#allocation6 + $0x10] sm:$0xff] }
  0x5d   : > { %346 = vmatpush1.msra.mxu0 %v303_v20  ;;  %661 = vmatprep.subr.mxu1 %v431_v33  ;;  %v412_v47 = vld [vmem:[#allocation8 + $0x38] sm:$0xff]  ;;  %v427_v49 = vld [vmem:[#allocation8 + $0xb0] sm:$0xff]  ;;  %v288_v50 = vld [vmem:[#allocation6 + $0x8] sm:$0xff] }
  0x5e   : > { %347 = vmatprep.subr.mxu0 %v302_v22  ;;  %662 = vmatpush3.msra.mxu1 %v415_v35  ;;  %v411_v51 = vld [vmem:[#allocation8 + $0x30] sm:$0xff]  ;;  %v287_v52 = vld [vmem:[#allocation6] sm:$0xff]  ;;  %v426_v53 = vld [vmem:[#allocation8 + $0xa8] sm:$0xff] }
  0x5f   : > { %348 = vmatpush1.msra.mxu0 %v301_v24  ;;  %663 = vmatprep.subr.mxu1 %v430_v37  ;;  %v286_v54 = vld [vmem:[%s1107_s1] sm:$0xff]  ;;  %v410_v55 = vld [vmem:[#allocation8 + $0x28] sm:$0xff]  ;;  %v425_v56 = vld [vmem:[#allocation8 + $0xa0] sm:$0xff]  ;;  %s858_s1 = sshll.u32 %s948_s15, 4  ;;  %s859_s1 = int_to_ptr.vmem [resolvable:$false] %s858_s1 }
  0x60   : > { %349 = vmatprep.subr.mxu0 %v300_v26  ;;  %664 = vmatpush3.msra.mxu1 %v414_v39  ;;  %v409_v57 = vld [vmem:[#allocation8 + $0x20] sm:$0xff]  ;;  %v424_v58 = vld [vmem:[#allocation8 + $0x98] sm:$0xff]  ;;  %v423_v60 = vld [vmem:[#allocation8 + $0x90] sm:$0xff]  ;;  %s860_s21 = scalar_lea.vmem %s859_s1, 256  ;;  %p861_p2 = scmp.lt.s32.totalorder %s537_s25, %s859_s1 }
  0x61   : > { %350 = vmatpush1.msra.mxu0 %v299_v28  ;;  %665 = vmatprep.subr.mxu1 %v429_v41  ;;  %v408_v59 = vld [vmem:[#allocation8 + $0x18] sm:$0xff]  ;;  %v407_v61 = vld [vmem:[#allocation8 + $0x10] sm:$0xff]  ;;  %v422_v62 = vld [vmem:[#allocation8 + $0x88] sm:$0xff]  ;;  %p862_p13 = scmp.lt.s32.totalorder %s860_s21, %s854_s13 }
  0x62   : > { %351 = vmatprep.subr.mxu0 %v298_v30  ;;  %666 = vmatpush3.msra.mxu1 %v413_v43  ;;  %v406_v63 = vld [vmem:[#allocation8 + $0x8] sm:$0xff]  ;;  %v421_v0 = vld [vmem:[#allocation8 + $0x80] sm:$0xff]  ;;  %v319_v5 = vld [vmem:[%s1168_s2] sm:$0x3] }
  0x63   : > { %352 = vmatpush1.msra.mxu0 %v297_v32  ;;  %667 = vmatprep.subr.mxu1 %v428_v45  ;;  %v405_v1 = vld [vmem:[#allocation8] sm:$0xff]  ;;  %v324_v7 = vrot.slane %v319_v5, %v323_v4  ;;  %v328_v8 = vrot.slane %v319_v5, %v327_v6  ;;  %v646_v17 = vld [vmem:[%s1170_s4] ss:$0 sm:$0xff]  ;;  %p863_p0 = por %p862_p13, %p861_p2 }
  0x64   : > { %353 = vmatprep.subr.mxu0 %v296_v34  ;;  %668 = vmatpush3.msra.mxu1 %v412_v47 }
  0x65   : > { %354 = vmatpush1.msra.mxu0 %v295_v36  ;;  %669 = vmatprep.subr.mxu1 %v427_v49  ;;  %p864_p5 = pnand %p863_p0, %p857_p11 }
  0x66   : > { %355 = vmatprep.subr.mxu0 %v294_v38  ;;  %670 = vmatpush3.msra.mxu1 %v411_v51 }
  0x67   : > { %356 = vmatpush1.msra.mxu0 %v293_v40  ;;  %671 = vmatprep.subr.mxu1 %v426_v53 }
  0x68   : > { %357 = vmatprep.subr.mxu0 %v292_v42  ;;  %672 = vmatpush3.msra.mxu1 %v410_v55 }
  0x69   : > { %358 = vmatpush1.msra.mxu0 %v291_v44  ;;  %673 = vmatprep.subr.mxu1 %v425_v56 }
  0x6a   : > { %359 = vmatprep.subr.mxu0 %v290_v46  ;;  %674 = vmatpush3.msra.mxu1 %v409_v57 }
  0x6b   : > { %360 = vmatpush1.msra.mxu0 %v289_v48  ;;  %675 = vmatprep.subr.mxu1 %v424_v58 }
  0x6c   : > { %361 = vmatprep.subr.mxu0 %v288_v50  ;;  %676 = vmatpush3.msra.mxu1 %v408_v59 }
  0x6d   : > { %362 = vmatpush1.msra.mxu0 %v287_v52  ;;  %677 = vmatprep.subr.mxu1 %v423_v60 }
  0x6e   : > { %396 = vmatmul.mubr.f32.vlgmr.msra.gmra.mxu0 %v286_v54  ;;  %678 = vmatpush3.msra.mxu1 %v407_v61 }
  0x6f   : > { %679 = vmatprep.subr.mxu1 %v422_v62 }
  0x70   : > { %680 = vmatpush3.msra.mxu1 %v406_v63 }
  0x71   : > { %681 = vmatprep.subr.mxu1 %v421_v0 }
  0x72   : > { %682 = vmatpush3.msra.mxu1 %v405_v1 }
 0x12e   : > { %v397_v9 = vpop.f32.mrf.mxu0 }
 0x12f   : > { %v398_v10 = vadd.f32 %v397_v9, %v324_v7 }
 0x130   : > { %v399_v11 = vpop.f32.mrf.mxu0 }
 0x131   : > { %v400_v12 = vadd.f32 %v399_v11, %v328_v8  ;;  %v402_v14 = vmax.f32 %v398_v10, 0.0 }
 0x133   : > { %v403_v13 = vmax.f32 %v400_v12, 0.0 }
 0x135   : > { %501 = vmatprep.mubr.f32.mxu1 %v403_v13 }
 0x136   : > { %502 = vmatmul.mubr.f32.vlgmr.msra.gmra.mxu1 %v402_v14 }
 0x1f6   : > { %v683_v15 = vpop.f32.mrf.mxu1 }
 0x1f8   : > { %v684_v16 = vpop.f32.mrf.mxu1 }
 0x1f9   : > { %v685_v18 = vadd.f32 %v684_v16, %v683_v15 }
 0x1fb   : > { %v520_v19 = vadd.f32 %v685_v18, %v646_v17 }
 0x1fd   : > { %521 = vst [vmem:[%s280_s24] sm:$0xff] %v520_v19 }
 0x1fe   : > { %867 = shalt.err (!%p864_p5)
}
 0x1ff   : > { %s868_s10 = scalar_lea.hbm %s534_s8, 128  ;;  %s872_s28 = scalar_lea.hbm %s1171_s5, 256 }
 0x200   : > { %p869_p10 = scmp.ne.s32.totalorder %s534_s8, %s868_s10  ;;  %p873_p6 = scmp.lt.s32.totalorder %s534_s8, %s1171_s5 }
 0x201   : > { %p874_p12 = scmp.lt.s32.totalorder %s872_s28, %s868_s10 }
 0x202   : > { %p870_p1 = pnand %p869_p10, %p1074_p7 }
 0x203   : > { %p875_p3 = por %p874_p12, %p873_p6 }
 0x204   : > { %p871_p4 = pneg %p870_p1 }
 0x206   : > { %p876_p8 = pnand %p875_p3, %p871_p4 }
 0x208   : > { %879 = shalt.err (!%p876_p8)
}
 0x209   : > { %696 = dma.vmem_to_hbm [thread:$0]  (%p1074_p7), %s537_s25, 128, %s534_s8, %s523_s9  }
 0x20a PF: > { %s548_s17 = sand.u32 1, %s918_s18   ;;  %p1187_p9 = scmp.ne.s32.totalorder %s1179_s29, 0 }
 0x20b   : > { %p1188_p11 = scmp.ge.s32.totalorder %s938_s23, 2  ;;  %s549_s24 = scalar_lea.sflag [#allocation5], %s548_s17 }
 0x20d   : > { %p710_p2 = pnand %p1188_p11, %p1187_p9 }
 0x20f   : > { %p711_p13 = pneg %p710_p2 }
 0x211   : > { %913 = dma.done.wait (%p711_p13), %s549_s24, 128  }
 0x212   : > { %915 = vsyncadd (%p711_p13), %s549_s24, 4294967168  ;;  %s22_s23 = sadd.s32 1, %s938_s23   ;;  %s1189_s18 = smov %s922_s19 }
 0x213   : > { %p19_p0 = scmp.ge.s32.totalorder %s22_s23, 4   ;;  %s1190_s19 = smov %s926_s20 }
 0x214   : > { %s1191_s20 = smov %s1083_s14  ;;  %s1192_s21 = smov %s934_s22 }
 0x215   : > { %s1193_s22 = smov %s1195_s7  ;;  %21 = sbr.rel (!%p19_p0) target bundleno = 9 (0x9), region = 101 }
 0x21a   :  { %554 = vsyncpa [#allocation4], 1 }
 0x21b   :  { %556 = vsyncpa [#allocation4 + $0x1], 1 }
 0x21c   :  { %557 = vsyncpa [#allocation7], 1 }
 0x21d   :  { %558 = vsyncpa [#allocation5], 1 }
 0x21e   :  { %560 = vsyncpa [#allocation5 + $0x1], 1 }

// kernel: tpu_custom_call.1
= control target key start
LH: loop header
LB: loop body
LE: loop exit
PB: predicated region body
PF: predicated region fallthrough
CT: control target
= control target key end

     0   :  { %s1166_s0 = inlined_call_operand.hbm [shape: f32[16,128], index: 0, kind: input, shape index: {}]   ;;  %s1167_s1 = inlined_call_operand.hbm [shape: f32[128,256], index: 1, kind: input, shape index: {}]   ;;  %s1168_s2 = inlined_call_operand.vmem [shape: f32[1,256], index: 2, kind: input, shape index: {}]   ;;  %s1169_s3 = inlined_call_operand.hbm [shape: f32[256,128], index: 3, kind: input, shape index: {}]   ;;  %s1170_s4 = inlined_call_operand.vmem [shape: f32[1,128], index: 4, kind: input, shape index: {}]   ;;  %s1171_s5 = inlined_call_operand.hbm [shape: f32[16,128], index: 5, kind: output, shape index: {}]  }
   0x1   :  { %1175 = sst [smem:[#allocation13_spill]] %s1167_s1 }
   0x2   :  { %10 = vsyncpa [#allocation4], 0 }
   0x3   :  { %12 = vsyncpa [#allocation4 + $0x1], 0 }
   0x4   :  { %13 = vsyncpa [#allocation7], 0 }
   0x5   :  { %14 = vsyncpa [#allocation5], 0 }
   0x6   :  { %16 = vsyncpa [#allocation5 + $0x1], 0  ;;  %s979_s18 = smov 0   ;;  %s981_s19 = smov 0  }
   0x7   :  { %s983_s20 = smov 0   ;;  %s985_s21 = smov 0  }
   0x8   :  { %s987_s22 = smov 0   ;;  %s989_s23 = smov 0  }
   0x9 LB: > { %s633_s24 = sadd.s32 4294967295, %s938_s23   ;;  %s634_s25 = sadd.s32 4294967294, %s938_s23   ;;  %s938_s23 = sphi %s989_s23, %s22_s23   ;;  %s934_s22 = sphi %s987_s22, %s1193_s22   ;;  %s930_s21 = sphi %s985_s21, %s1192_s21   ;;  %s926_s20 = sphi %s983_s20, %s1191_s20   ;;  %s922_s19 = sphi %s981_s19, %s1190_s19   ;;  %s918_s18 = sphi %s979_s18, %s1189_s18  }
   0xa   : > { %p54_p0 = scmp.ne.s32.totalorder %s922_s19, %s918_s18  ;;  %p1013_p1 = scmp.eq.s32.totalorder %s633_s24, 0 }
   0xb   : > { %p1017_p2 = scmp.eq.s32.totalorder %s633_s24, 1  ;;  %p168_p3 = scmp.eq.s32.totalorder %s634_s25, 1 }
   0xc   : > { %s1176_s26 = scalar_select %p1013_p1, 1, 0 }
   0xd   : > { %p1023_p4 = por %p1013_p1, %p54_p0  ;;  %p635_p5 = scmp.ge.s32.totalorder %s938_s23, 1 }
   0xe   : > { %p1028_p6 = por %p168_p3, %p54_p0  ;;  %p175_p7 = scmp.lt.s32.totalorder %s938_s23, 3 }
   0xf   : > { %s1178_s28 = scalar_select %p1023_p4, 1, 0 }
  0x10   : > { %s1179_s29 = scalar_select %p1028_p6, 1, 0 }
  0x11   : > { %p1033_p8 = pnand %p635_p5, %p175_p7  ;;  %s940_s6 = smov [#allocation6]  }
  0x12   : > { %s187_s7 = sshll.u32 %s940_s6, 4  ;;  %s941_s9 = smov [#allocation8]   ;;  %s188_s7 = int_to_ptr.vmem [resolvable:$true] %s187_s7 }
  0x13   : > { %p698_p9 = pneg %p1033_p8  ;;  %s203_s10 = sshll.u32 %s941_s9, 4  ;;  %s204_s10 = int_to_ptr.vmem [resolvable:$true] %s203_s10 }
  0x14   : > { %s785_s11 = scalar_lea.vmem %s188_s7, 4096  ;;  %p793_p5 = scmp.lt.s32.totalorder %s188_s7, %s188_s7 }
  0x15   : > { %p1042_p11 = pnand %p698_p9, %p1013_p1  ;;  %p786_p13 = scmp.ne.s32.totalorder %s188_s7, %s785_s11 }
  0x16   : > { %p794_p7 = scmp.lt.s32.totalorder %s785_s11, %s785_s11 }
  0x17   : > { %p776_p12 = pneg %p1042_p11 }
  0x18   : > { %p795_p10 = por %p794_p7, %p793_p5 }
  0x19   : > { %p788_p0 = pnand %p786_p13, %p776_p12 }
  0x1b   : > { %p789_p3 = pneg %p788_p0 }
  0x1d   : > { %p796_p9 = pnand %p795_p10, %p789_p3 }
  0x1f   : > { %799 = shalt.err (!%p796_p9)
}
  0x20   : > { %s942_s12 = smov 256   ;;  %s943_s13 = smov 16  }
  0x21   : > { %s1182_s1 = sld [smem:[#allocation13_spill]]  ;;  %s811_s16 = scalar_lea.vmem %s204_s10, 4096 }
  0x22   : > { %p812_p6 = scmp.ne.s32.totalorder %s204_s10, %s811_s16  ;;  %p819_p1 = scmp.lt.s32.totalorder %s204_s10, %s204_s10 }
  0x23   : > { %p820_p4 = scmp.lt.s32.totalorder %s811_s16, %s811_s16 }
  0x24   : > { %p814_p13 = pnand %p812_p6, %p776_p12 }
  0x25   : > { %p821_p5 = por %p820_p4, %p819_p1 }
  0x26   : > { %p815_p0 = pneg %p814_p13 }
  0x27   : > { %701 = dma.hbm_to_vmem [thread:$0]  (!%p1042_p11), %s1182_s1, 4096, %s188_s7, [#allocation7], %s942_s12, %s942_s12, %s943_s13  }
  0x28   : > { %p822_p10 = pnand %p821_p5, %p815_p0 }
  0x2a   : > { %825 = shalt.err (!%p822_p10)
}
  0x2b   : > { %s944_s17 = smov 128   ;;  %s945_s24 = smov 8  }
  0x2c   : > { %704 = dma.hbm_to_vmem [thread:$0]  (!%p1042_p11), %s1169_s3, 4096, %s204_s10, [#allocation7], %s944_s17, %s944_s17, %s945_s24  }
  0x2d   : > { %s34_s7 = sadd.s32 1, %s934_s22  ;;  %s41_s9 = sadd.s32 1, %s926_s20 }
  0x2e   : > { %p36_p1 = scmp.ge.s32.totalorder %s34_s7, 2  ;;  %p48_p4 = scmp.ne.s32.totalorder %s926_s20, %s922_s19 }
  0x2f   : > { %p49_p6 = scmp.eq.s32.totalorder %s938_s23, 0  ;;  %p715_p12 = scmp.lt.s32.totalorder %s938_s23, 2 }
  0x30   : > { %s1195_s7 = smov (%p36_p1, %s34_s7), 0  ;;  %p1074_p7 = por %p1017_p2, %p48_p4 }
  0x31   : > { %p50_p3 = por %p49_p6, %p48_p4  ;;  %s38_s8 = ssub.s32 %s934_s22, %s1195_s7 }
  0x32   : > { %s220_s12 = sand.u32 1, %s926_s20   ;;  %p39_p9 = scmp.eq.s32.totalorder %s38_s8, 0 }
  0x33   : > { %s639_s10 = sshll.u32 %s220_s12, 3  ;;  %s640_s13 = sshll.u32 %s934_s22, 7 }
  0x34   : > { %s1083_s14 = scalar_select %p39_p9, %s926_s20, %s41_s9  }
  0x35   : > { %s229_s17 = scalar_lea.hbm %s1166_s0, %s640_s13  ;;  %s224_s24 = scalar_lea.vmem [#allocation3], %s639_s10 }
  0x36   : > { %s231_s25 = sshll.u32 %s224_s24, 4  ;;  %p1090_p11 = pnand %p715_p12, %p50_p3  ;;  %s232_s25 = int_to_ptr.vmem [resolvable:$true] %s231_s25 }
  0x37   : > { %s221_s6 = scalar_lea.sflag [#allocation4], %s220_s12  ;;  %s839_s8 = scalar_lea.vmem %s232_s25, 128 }
  0x38   : > { %p828_p2 = pneg %p1090_p11  ;;  %p840_p13 = scmp.ne.s32.totalorder %s232_s25, %s839_s8 }
  0x39   : > { %s946_s9 = smov [#allocation3]  }
  0x3a   : > { %p842_p0 = pnand %p840_p13, %p828_p2  ;;  %s844_s1 = sshll.u32 %s946_s9, 4  ;;  %s845_s1 = int_to_ptr.vmem [resolvable:$false] %s844_s1 }
  0x3b   : > { %s846_s13 = scalar_lea.vmem %s845_s1, 256  ;;  %p847_p10 = scmp.lt.s32.totalorder %s232_s25, %s845_s1 }
  0x3c   : > { %p843_p5 = pneg %p842_p0  ;;  %p848_p1 = scmp.lt.s32.totalorder %s846_s13, %s839_s8 }
  0x3e   : > { %p849_p4 = por %p848_p1, %p847_p10 }
  0x40   : > { %p850_p6 = pnand %p849_p4, %p843_p5 }
  0x42   : > { %853 = shalt.err (!%p850_p6)
}
  0x43   : > { %708 = dma.hbm_to_vmem [thread:$0]  (!%p1090_p11), %s229_s17, 128, %s232_s25, %s221_s6  }
  0x44   : > { %240 = sbr.rel (%p1033_p8) target bundleno = 522 (0x20a), region = 40  ;;  %s1101_s12 = sand.u32 (!%p1033_p8), 1, %s922_s19  }
  0x45   : > { %s642_s10 = sshll.u32 (!%p1033_p8), %s1101_s12, 3  ;;  %s243_s15 = scalar_lea.sflag (!%p1033_p8), [#allocation4], %s1101_s12 }
  0x46   : > { %s1107_s1 = scalar_lea.vmem (!%p1033_p8), [#allocation3], %s642_s10  ;;  %p1185_p12 = scmp.ne.s32.totalorder (!%p1033_p8), %s1178_s28, 0 }
  0x49   : > { %905 = dma.done.wait (%p1185_p12), %s243_s15, 128  }
  0x4a   : > { %907 = vsyncadd (%p1185_p12), %s243_s15, 4294967168  ;;  %p1186_p3 = scmp.ne.s32.totalorder %s1176_s26, 0 }
  0x4c   : > { %909 = dma.done.wait (%p1186_p3), [#allocation7], 8192  }
  0x4d   : > { %911 = vsyncadd (%p1186_p3), [#allocation7], 4294959104  ;;  %v947_v0 = vmov 0.0   ;;  %v318_v1 = vld [vmem:[#allocation6 + $0xf8] sm:$0xff]  ;;  %v317_v2 = vld [vmem:[#allocation6 + $0xf0] sm:$0xff]  ;;  %s648_s17 = sshll.u32 %s930_s21, 7 }
  0x4e   : > { %395 = vmatprep.mubr.f32.mxu0 %v947_v0  ;;  %v316_v3 = vld [vmem:[#allocation6 + $0xe8] sm:$0xff]  ;;  %331 = vmatprep.subr.mxu0 %v318_v1  ;;  %v315_v4 = vld [vmem:[#allocation6 + $0xe0] sm:$0xff]  ;;  %v314_v5 = vld [vmem:[#allocation6 + $0xd8] sm:$0xff]  ;;  %s280_s24 = scalar_lea.vmem [#allocation9], %s642_s10  ;;  %s534_s8 = scalar_lea.hbm %s1171_s5, %s648_s17 }
  0x4f   : > { %332 = vmatpush1.msra.mxu0 %v317_v2  ;;  %v313_v6 = vld [vmem:[#allocation6 + $0xd0] sm:$0xff]  ;;  %v312_v7 = vld [vmem:[#allocation6 + $0xc8] sm:$0xff]  ;;  %v311_v8 = vld [vmem:[#allocation6 + $0xc0] sm:$0xff]  ;;  %v321_v2 = vlaneseq  ;;  %s536_s25 = sshll.u32 %s280_s24, 4  ;;  %s523_s9 = scalar_lea.sflag [#allocation5], %s1101_s12  ;;  %s537_s25 = int_to_ptr.vmem [resolvable:$true] %s536_s25 }
  0x50   : > { %333 = vmatprep.subr.mxu0 %v316_v3  ;;  %v310_v9 = vld [vmem:[#allocation6 + $0xb8] sm:$0xff]  ;;  %v309_v10 = vld [vmem:[#allocation6 + $0xb0] sm:$0xff]  ;;  %v308_v11 = vld [vmem:[#allocation6 + $0xa8] sm:$0xff]  ;;  %s854_s13 = scalar_lea.vmem %s537_s25, 128  ;;  %s948_s15 = smov [#allocation9]  }
  0x51   : > { %334 = vmatpush1.msra.mxu0 %v315_v4  ;;  %v307_v12 = vld [vmem:[#allocation6 + $0xa0] sm:$0xff]  ;;  %v306_v13 = vld [vmem:[#allocation6 + $0x98] sm:$0xff]  ;;  %v305_v14 = vld [vmem:[#allocation6 + $0x90] sm:$0xff]  ;;  %v322_v3 = vshrl.u32 %v321_v2, 7  ;;  %p855_p8 = scmp.ne.s32.totalorder %s537_s25, %s854_s13 }
  0x52   : > { %335 = vmatprep.subr.mxu0 %v314_v5  ;;  %v436_v15 = vld [vmem:[#allocation8 + $0xf8] sm:$0xff]  ;;  %v435_v17 = vld [vmem:[#allocation8 + $0xf0] sm:$0xff]  ;;  %v304_v18 = vld [vmem:[#allocation6 + $0x88] sm:$0xff] }
  0x53   : > { %336 = vmatpush1.msra.mxu0 %v313_v6  ;;  %v420_v16 = vld [vmem:[#allocation8 + $0x78] sm:$0xff]  ;;  %651 = vmatprep.subr.mxu1 %v436_v15  ;;  %v419_v19 = vld [vmem:[#allocation8 + $0x70] sm:$0xff]  ;;  %v303_v20 = vld [vmem:[#allocation6 + $0x80] sm:$0xff]  ;;  %v323_v4 = vsub.s32 0, %v322_v3  ;;  %v327_v6 = vsub.s32 1, %v322_v3  ;;  %p856_p9 = pnand %p855_p8, %p1074_p7 }
  0x54   : > { %337 = vmatprep.subr.mxu0 %v312_v7  ;;  %652 = vmatpush3.msra.mxu1 %v420_v16  ;;  %v434_v21 = vld [vmem:[#allocation8 + $0xe8] sm:$0xff]  ;;  %v302_v22 = vld [vmem:[#allocation6 + $0x78] sm:$0xff]  ;;  %v301_v24 = vld [vmem:[#allocation6 + $0x70] sm:$0xff] }
  0x55   : > { %338 = vmatpush1.msra.mxu0 %v311_v8  ;;  %653 = vmatprep.subr.mxu1 %v435_v17  ;;  %v418_v23 = vld [vmem:[#allocation8 + $0x68] sm:$0xff]  ;;  %v433_v25 = vld [vmem:[#allocation8 + $0xe0] sm:$0xff]  ;;  %v432_v29 = vld [vmem:[#allocation8 + $0xd8] sm:$0xff]  ;;  %p857_p11 = pneg %p856_p9 }
  0x56   : > { %339 = vmatprep.subr.mxu0 %v310_v9  ;;  %654 = vmatpush3.msra.mxu1 %v419_v19  ;;  %v300_v26 = vld [vmem:[#allocation6 + $0x68] sm:$0xff]  ;;  %v417_v27 = vld [vmem:[#allocation8 + $0x60] sm:$0xff]  ;;  %v298_v30 = vld [vmem:[#allocation6 + $0x58] sm:$0xff] }
  0x57   : > { %340 = vmatpush1.msra.mxu0 %v309_v10  ;;  %655 = vmatprep.subr.mxu1 %v434_v21  ;;  %v299_v28 = vld [vmem:[#allocation6 + $0x60] sm:$0xff]  ;;  %v416_v31 = vld [vmem:[#allocation8 + $0x58] sm:$0xff]  ;;  %v297_v32 = vld [vmem:[#allocation6 + $0x50] sm:$0xff] }
  0x58   : > { %341 = vmatprep.subr.mxu0 %v308_v11  ;;  %656 = vmatpush3.msra.mxu1 %v418_v23  ;;  %v431_v33 = vld [vmem:[#allocation8 + $0xd0] sm:$0xff]  ;;  %v296_v34 = vld [vmem:[#allocation6 + $0x48] sm:$0xff]  ;;  %v295_v36 = vld [vmem:[#allocation6 + $0x40] sm:$0xff] }
  0x59   : > { %342 = vmatpush1.msra.mxu0 %v307_v12  ;;  %657 = vmatprep.subr.mxu1 %v433_v25  ;;  %v415_v35 = vld [vmem:[#allocation8 + $0x50] sm:$0xff]  ;;  %v430_v37 = vld [vmem:[#allocation8 + $0xc8] sm:$0xff]  ;;  %v294_v38 = vld [vmem:[#allocation6 + $0x38] sm:$0xff] }
  0x5a   : > { %343 = vmatprep.subr.mxu0 %v306_v13  ;;  %658 = vmatpush3.msra.mxu1 %v417_v27  ;;  %v414_v39 = vld [vmem:[#allocation8 + $0x48] sm:$0xff]  ;;  %v293_v40 = vld [vmem:[#allocation6 + $0x30] sm:$0xff]  ;;  %v429_v41 = vld [vmem:[#allocation8 + $0xc0] sm:$0xff] }
  0x5b   : > { %344 = vmatpush1.msra.mxu0 %v305_v14  ;;  %659 = vmatprep.subr.mxu1 %v432_v29  ;;  %v292_v42 = vld [vmem:[#allocation6 + $0x28] sm:$0xff]  ;;  %v413_v43 = vld [vmem:[#allocation8 + $0x40] sm:$0xff]  ;;  %v428_v45 = vld [vmem:[#allocation8 + $0xb8] sm:$0xff] }
  0x5c   : > { %345 = vmatprep.subr.mxu0 %v304_v18  ;;  %660 = vmatpush3.msra.mxu1 %v416_v31  ;;  %v291_v44 = vld [vmem:[#allocation6 + $0x20] sm:$0xff]  ;;  %v290_v46 = vld [vmem:[#allocation6 + $0x18] sm:$0xff]  ;;  %v289_v48 = vld [vmem:[#allocation6 + $0x10] sm:$0xff] }
  0x5d   : > { %346 = vmatpush1.msra.mxu0 %v303_v20  ;;  %661 = vmatprep.subr.mxu1 %v431_v33  ;;  %v412_v47 = vld [vmem:[#allocation8 + $0x38] sm:$0xff]  ;;  %v427_v49 = vld [vmem:[#allocation8 + $0xb0] sm:$0xff]  ;;  %v288_v50 = vld [vmem:[#allocation6 + $0x8] sm:$0xff] }
  0x5e   : > { %347 = vmatprep.subr.mxu0 %v302_v22  ;;  %662 = vmatpush3.msra.mxu1 %v415_v35  ;;  %v411_v51 = vld [vmem:[#allocation8 + $0x30] sm:$0xff]  ;;  %v287_v52 = vld [vmem:[#allocation6] sm:$0xff]  ;;  %v426_v53 = vld [vmem:[#allocation8 + $0xa8] sm:$0xff] }
  0x5f   : > { %348 = vmatpush1.msra.mxu0 %v301_v24  ;;  %663 = vmatprep.subr.mxu1 %v430_v37  ;;  %v286_v54 = vld [vmem:[%s1107_s1] sm:$0xff]  ;;  %v410_v55 = vld [vmem:[#allocation8 + $0x28] sm:$0xff]  ;;  %v425_v56 = vld [vmem:[#allocation8 + $0xa0] sm:$0xff]  ;;  %s858_s1 = sshll.u32 %s948_s15, 4  ;;  %s859_s1 = int_to_ptr.vmem [resolvable:$false] %s858_s1 }
  0x60   : > { %349 = vmatprep.subr.mxu0 %v300_v26  ;;  %664 = vmatpush3.msra.mxu1 %v414_v39  ;;  %v409_v57 = vld [vmem:[#allocation8 + $0x20] sm:$0xff]  ;;  %v424_v58 = vld [vmem:[#allocation8 + $0x98] sm:$0xff]  ;;  %v423_v60 = vld [vmem:[#allocation8 + $0x90] sm:$0xff]  ;;  %s860_s21 = scalar_lea.vmem %s859_s1, 256  ;;  %p861_p2 = scmp.lt.s32.totalorder %s537_s25, %s859_s1 }
  0x61   : > { %350 = vmatpush1.msra.mxu0 %v299_v28  ;;  %665 = vmatprep.subr.mxu1 %v429_v41  ;;  %v408_v59 = vld [vmem:[#allocation8 + $0x18] sm:$0xff]  ;;  %v407_v61 = vld [vmem:[#allocation8 + $0x10] sm:$0xff]  ;;  %v422_v62 = vld [vmem:[#allocation8 + $0x88] sm:$0xff]  ;;  %p862_p13 = scmp.lt.s32.totalorder %s860_s21, %s854_s13 }
  0x62   : > { %351 = vmatprep.subr.mxu0 %v298_v30  ;;  %666 = vmatpush3.msra.mxu1 %v413_v43  ;;  %v406_v63 = vld [vmem:[#allocation8 + $0x8] sm:$0xff]  ;;  %v421_v0 = vld [vmem:[#allocation8 + $0x80] sm:$0xff]  ;;  %v319_v5 = vld [vmem:[%s1168_s2] sm:$0x3] }
  0x63   : > { %352 = vmatpush1.msra.mxu0 %v297_v32  ;;  %667 = vmatprep.subr.mxu1 %v428_v45  ;;  %v405_v1 = vld [vmem:[#allocation8] sm:$0xff]  ;;  %v324_v7 = vrot.slane %v319_v5, %v323_v4  ;;  %v328_v8 = vrot.slane %v319_v5, %v327_v6  ;;  %v646_v17 = vld [vmem:[%s1170_s4] ss:$0 sm:$0xff]  ;;  %p863_p0 = por %p862_p13, %p861_p2 }
  0x64   : > { %353 = vmatprep.subr.mxu0 %v296_v34  ;;  %668 = vmatpush3.msra.mxu1 %v412_v47 }
  0x65   : > { %354 = vmatpush1.msra.mxu0 %v295_v36  ;;  %669 = vmatprep.subr.mxu1 %v427_v49  ;;  %p864_p5 = pnand %p863_p0, %p857_p11 }
  0x66   : > { %355 = vmatprep.subr.mxu0 %v294_v38  ;;  %670 = vmatpush3.msra.mxu1 %v411_v51 }
  0x67   : > { %356 = vmatpush1.msra.mxu0 %v293_v40  ;;  %671 = vmatprep.subr.mxu1 %v426_v53 }
  0x68   : > { %357 = vmatprep.subr.mxu0 %v292_v42  ;;  %672 = vmatpush3.msra.mxu1 %v410_v55 }
  0x69   : > { %358 = vmatpush1.msra.mxu0 %v291_v44  ;;  %673 = vmatprep.subr.mxu1 %v425_v56 }
  0x6a   : > { %359 = vmatprep.subr.mxu0 %v290_v46  ;;  %674 = vmatpush3.msra.mxu1 %v409_v57 }
  0x6b   : > { %360 = vmatpush1.msra.mxu0 %v289_v48  ;;  %675 = vmatprep.subr.mxu1 %v424_v58 }
  0x6c   : > { %361 = vmatprep.subr.mxu0 %v288_v50  ;;  %676 = vmatpush3.msra.mxu1 %v408_v59 }
  0x6d   : > { %362 = vmatpush1.msra.mxu0 %v287_v52  ;;  %677 = vmatprep.subr.mxu1 %v423_v60 }
  0x6e   : > { %396 = vmatmul.mubr.f32.vlgmr.msra.gmra.mxu0 %v286_v54  ;;  %678 = vmatpush3.msra.mxu1 %v407_v61 }
  0x6f   : > { %679 = vmatprep.subr.mxu1 %v422_v62 }
  0x70   : > { %680 = vmatpush3.msra.mxu1 %v406_v63 }
  0x71   : > { %681 = vmatprep.subr.mxu1 %v421_v0 }
  0x72   : > { %682 = vmatpush3.msra.mxu1 %v405_v1 }
 0x12e   : > { %v397_v9 = vpop.f32.mrf.mxu0 }
 0x12f   : > { %v398_v10 = vadd.f32 %v397_v9, %v324_v7 }
 0x130   : > { %v399_v11 = vpop.f32.mrf.mxu0 }
 0x131   : > { %v400_v12 = vadd.f32 %v399_v11, %v328_v8  ;;  %v402_v14 = vmax.f32 %v398_v10, 0.0 }
 0x133   : > { %v403_v13 = vmax.f32 %v400_v12, 0.0 }
 0x135   : > { %501 = vmatprep.mubr.f32.mxu1 %v403_v13 }
 0x136   : > { %502 = vmatmul.mubr.f32.vlgmr.msra.gmra.mxu1 %v402_v14 }
 0x1f6   : > { %v683_v15 = vpop.f32.mrf.mxu1 }
 0x1f8   : > { %v684_v16 = vpop.f32.mrf.mxu1 }
 0x1f9   : > { %v685_v18 = vadd.f32 %v684_v16, %v683_v15 }
 0x1fb   : > { %v520_v19 = vadd.f32 %v685_v18, %v646_v17 }
 0x1fd   : > { %521 = vst [vmem:[%s280_s24] sm:$0xff] %v520_v19 }
 0x1fe   : > { %867 = shalt.err (!%p864_p5)
}
 0x1ff   : > { %s868_s10 = scalar_lea.hbm %s534_s8, 128  ;;  %s872_s28 = scalar_lea.hbm %s1171_s5, 256 }
 0x200   : > { %p869_p10 = scmp.ne.s32.totalorder %s534_s8, %s868_s10  ;;  %p873_p6 = scmp.lt.s32.totalorder %s534_s8, %s1171_s5 }
 0x201   : > { %p874_p12 = scmp.lt.s32.totalorder %s872_s28, %s868_s10 }
 0x202   : > { %p870_p1 = pnand %p869_p10, %p1074_p7 }
 0x203   : > { %p875_p3 = por %p874_p12, %p873_p6 }
 0x204   : > { %p871_p4 = pneg %p870_p1 }
 0x206   : > { %p876_p8 = pnand %p875_p3, %p871_p4 }
 0x208   : > { %879 = shalt.err (!%p876_p8)
}
 0x209   : > { %696 = dma.vmem_to_hbm [thread:$0]  (%p1074_p7), %s537_s25, 128, %s534_s8, %s523_s9  }
 0x20a PF: > { %s548_s17 = sand.u32 1, %s918_s18   ;;  %p1187_p9 = scmp.ne.s32.totalorder %s1179_s29, 0 }
 0x20b   : > { %p1188_p11 = scmp.ge.s32.totalorder %s938_s23, 2  ;;  %s549_s24 = scalar_lea.sflag [#allocation5], %s548_s17 }
 0x20d   : > { %p710_p2 = pnand %p1188_p11, %p1187_p9 }
 0x20f   : > { %p711_p13 = pneg %p710_p2 }
 0x211   : > { %913 = dma.done.wait (%p711_p13), %s549_s24, 128  }
 0x212   : > { %915 = vsyncadd (%p711_p13), %s549_s24, 4294967168  ;;  %s22_s23 = sadd.s32 1, %s938_s23   ;;  %s1189_s18 = smov %s922_s19 }
 0x213   : > { %p19_p0 = scmp.ge.s32.totalorder %s22_s23, 4   ;;  %s1190_s19 = smov %s926_s20 }
 0x214   : > { %s1191_s20 = smov %s1083_s14  ;;  %s1192_s21 = smov %s934_s22 }
 0x215   : > { %s1193_s22 = smov %s1195_s7  ;;  %21 = sbr.rel (!%p19_p0) target bundleno = 9 (0x9), region = 101 }
 0x21a   :  { %554 = vsyncpa [#allocation4], 1 }
 0x21b   :  { %556 = vsyncpa [#allocation4 + $0x1], 1 }
 0x21c   :  { %557 = vsyncpa [#allocation7], 1 }
 0x21d   :  { %558 = vsyncpa [#allocation5], 1 }
 0x21e   :  { %560 = vsyncpa [#allocation5 + $0x1], 1 }

</bundles_post_ra>
